<compile_context>
chip_gen: v7x
topology: tpu7x:2x2x1
jax: 0.10.0
libtpu: 0.0.40
codegen_flags: <defaults>
</compile_context>

<pallas_src>
import functools

import jax
import jax.numpy as jnp
from jax.experimental import pallas as pl
from jax.experimental.pallas import tpu as pltpu

_LANE = 128
_SUBLANE = 8
_MAX_TB = 1024


def _round_up(n: int, m: int) -> int:
    return ((n + m - 1) // m) * m


def _vmem_capacity_bytes() -> int:
    try:
        cap = int(pltpu.get_tpu_info().vmem_capacity_bytes)
        if cap > 0:
            return cap
    except Exception:
        pass
    return 64 * 1024 * 1024  # conservative fallback (v7x per-TensorCore VMEM)


# ----------------------------- kernels ------------------------------------- #

def _permute_kernel_bf16(x_ref, p_ref, o_ref):
    # Single native bf16 MXU pass; f32 accumulation of a pure selection is exact.
    o_ref[...] = jnp.dot(
        x_ref[...], p_ref[...],
        precision=jax.lax.Precision.DEFAULT,
        preferred_element_type=jnp.float32,
    ).astype(o_ref.dtype)


def _permute_kernel_f32(x_ref, p_ref, o_ref):
    # Exact 3-way bf16 split of the f32 input: x == hi + mid + lo exactly
    # (each residual subtraction is exact; residuals fit in 8 mantissa bits).
    # Since P is 0/1, each dot output element is a single selected term, so
    # summing the three f32 partials reconstructs x[:, idx] bit-exactly with
    # only 3 MXU passes (vs. 6 for Precision.HIGHEST).
    x = x_ref[...]
    hi = x.astype(jnp.bfloat16)
    r1 = x - hi.astype(jnp.float32)
    mid = r1.astype(jnp.bfloat16)
    lo = (r1 - mid.astype(jnp.float32)).astype(jnp.bfloat16)

    p = p_ref[...]
    acc = jnp.dot(hi, p, precision=jax.lax.Precision.DEFAULT,
                  preferred_element_type=jnp.float32)
    acc = acc + jnp.dot(mid, p, precision=jax.lax.Precision.DEFAULT,
                        preferred_element_type=jnp.float32)
    acc = acc + jnp.dot(lo, p, precision=jax.lax.Precision.DEFAULT,
                        preferred_element_type=jnp.float32)
    o_ref[...] = acc


# --------------------------- planning / wrapper ----------------------------- #

def _plan(batch: int, dim_p: int, x_itemsize: int, single_buffer_p: bool):
    """Choose (tb, tn, batch_p, vmem_limit) against the real VMEM capacity."""
    cap = _vmem_capacity_bytes()
    budget = int(cap * 0.7)
    p_itemsize = 2  # P is cached as bf16

    # ---- N tile (columns of P / output). Prefer all of P resident. ----
    m = dim_p // _LANE
    full_p_bufs = 1 if single_buffer_p else 2
    if full_p_bufs * dim_p * dim_p * p_itemsize <= budget // 2:
        tn = dim_p
        p_bytes = full_p_bufs * dim_p * dim_p * p_itemsize
    else:
        # Tile P's columns: largest multiple of 128 dividing dim_p that fits
        # (double-buffered, since its block index then varies with the grid).
        tn = _LANE
        for d in range(m, 0, -1):
            if m % d == 0 and 2 * dim_p * (d * _LANE) * p_itemsize <= budget // 2:
                tn = d * _LANE
                break
        p_bytes = 2 * dim_p * tn * p_itemsize

    # ---- batch tile: VMEM per row of a batch tile ----
    per_row = 2 * dim_p * x_itemsize + 2 * tn * x_itemsize      # x in + out (x2 bufs)
    if x_itemsize == 4:
        per_row += 3 * dim_p * 2 + tn * 4                       # hi/mid/lo + f32 acc
    remaining = max(budget - p_bytes, _SUBLANE * per_row)
    tb_cap = max((remaining // per_row) // _SUBLANE * _SUBLANE, _SUBLANE)
    tb_cap = min(tb_cap, _MAX_TB)

    batch8 = max(_round_up(batch, _SUBLANE), _SUBLANE)
    n_b = pl.cdiv(batch8, tb_cap)
    if n_b == 1 and batch8 >= 2 * _SUBLANE:
        n_b = 2  # give both v7x TensorCores work; ~free on single-TC chips
    tb = _round_up(pl.cdiv(batch8, n_b), _SUBLANE)               # padding <= 7*n_b rows
    batch_p = tb * n_b

    vmem_needed = p_bytes + tb * per_row
    vmem_limit = int(min(max(vmem_needed + (8 << 20), 32 << 20), cap))
    return tb, tn, batch_p, vmem_limit


@functools.partial(
    jax.jit,
    static_argnames=("tb", "tn", "batch_p", "single_buffer_p", "vmem_limit"),
)
def _permute_pallas(x, p, *, tb, tn, batch_p, single_buffer_p, vmem_limit):
    """x: [batch, dim] (unpadded), p: [dim_p, dim_p] bf16 one-hot permutation."""
    batch, dim = x.shape
    dim_p = p.shape[0]

    # Pad inside the jit so it fuses with the dispatch (no extra eager HBM pass).
    x_p = x
    if (batch_p, dim_p) != (batch, dim):
        x_p = jnp.pad(x, ((0, batch_p - batch), (0, dim_p - dim)))

    n_b = batch_p // tb
    n_n = dim_p // tn
    kernel = _permute_kernel_f32 if x.dtype == jnp.float32 else _permute_kernel_bf16

    if single_buffer_p and n_n == 1:
        # Grid-invariant P: one resident copy instead of a double buffer.
        p_spec = pl.BlockSpec((dim_p, tn), lambda i, j: (0, j),
                              pipeline_mode=pl.Buffered(1))
    else:
        p_spec = pl.BlockSpec((dim_p, tn), lambda i, j: (0, j))

    n_pass = 3 if x.dtype == jnp.float32 else 1
    cost = pl.CostEstimate(
        flops=2 * n_pass * batch_p * dim_p * dim_p,
        bytes_accessed=(2 * batch_p * dim_p * x.dtype.itemsize
                        + dim_p * dim_p * p.dtype.itemsize),
        transcendentals=0,
    )

    out_p = pl.pallas_call(
        kernel,
        out_shape=jax.ShapeDtypeStruct((batch_p, dim_p), x.dtype),
        grid=(n_b, n_n),
        in_specs=[
            pl.BlockSpec((tb, dim_p), lambda i, j: (i, 0)),   # streamed batch tiles
            p_spec,                                           # (tiled) permutation matrix
        ],
        out_specs=pl.BlockSpec((tb, tn), lambda i, j: (i, j)),  # lane-dense output tiles
        compiler_params=pltpu.CompilerParams(
            dimension_semantics=("parallel", "parallel"),
            vmem_limit_bytes=vmem_limit,
        ),
        cost_estimate=cost,
    )(x_p, p)

    return out_p[:batch, :dim]


def _perm_matrix(indices: jnp.ndarray, dim_p: int) -> jnp.ndarray:
    # P[i, j] = 1 iff i == indices[j]  =>  (x @ P)[:, j] = x[:, indices[j]]
    # Stored as bf16: 0/1 entries are exact, and bf16 halves HBM/VMEM traffic.
    return (jnp.arange(dim_p)[:, None] == indices[None, :]).astype(jnp.bfloat16)


class PermutationLayer:
    """JAX/Pallas port of the PyTorch PermutationLayer."""

    def __init__(self, dim: int, key: jax.Array) -> None:
        self.dim = dim
        self.indices = jax.random.permutation(key, dim)        # torch.randperm(dim)
        self.reverse_indices = jnp.argsort(self.indices)       # torch.argsort(indices)

        # Lane-dense padded size; pad region of P is the identity permutation.
        self.dim_p = max(_round_up(dim, _LANE), _LANE)
        pad = jnp.arange(dim, self.dim_p, dtype=self.indices.dtype)
        idx_fwd = jnp.concatenate([self.indices, pad])
        idx_rev = jnp.concatenate([self.reverse_indices, pad])

        # Cache both permutation matrices once (no per-call O(dim^2) rebuild/cast).
        self._p_fwd = _perm_matrix(idx_fwd, self.dim_p)
        self._p_rev = _perm_matrix(idx_rev, self.dim_p)

    def _apply(self, x: jnp.ndarray, p: jnp.ndarray) -> jnp.ndarray:
        assert x.ndim == 2 and x.shape[1] == self.dim
        if x.dtype not in (jnp.float32, jnp.bfloat16):
            raise NotImplementedError(
                "MXU permutation path supports float32 / bfloat16 inputs")
        batch = x.shape[0]
        itemsize = jnp.dtype(x.dtype).itemsize

        # Try the single-buffered resident-P variant first; fall back to the
        # default double-buffered pipeline if pl.Buffered(1) is rejected.
        last_err = None
        for single in (True, False):
            tb, tn, batch_p, vmem_limit = _plan(batch, self.dim_p, itemsize, single)
            try:
                return _permute_pallas(
                    x, p, tb=tb, tn=tn, batch_p=batch_p,
                    single_buffer_p=single, vmem_limit=vmem_limit)
            except Exception as e:  # noqa: BLE001 - retry with conservative buffering
                last_err = e
        raise last_err

    def forward(self, x: jnp.ndarray) -> jnp.ndarray:
        return self._apply(x, self._p_fwd)

    def reverse(self, x: jnp.ndarray) -> jnp.ndarray:
        return self._apply(x, self._p_rev)


if __name__ == "__main__":
    key = jax.random.PRNGKey(0)
    k_perm, k_x = jax.random.split(key)

    # Small shapes that exercise lane padding (dim 96 -> 128) and the
    # equalized batch tiling (batch 20 -> two 16-row tiles).
    batch, dim = 20, 96
    layer = PermutationLayer(dim, k_perm)

    x = jax.random.normal(k_x, (batch, dim), dtype=jnp.float32)

    # float32 path (3-way bf16 split, exact)
    out = jax.block_until_ready(layer.forward(x))
    ref = x[:, layer.indices]
    assert out.shape == ref.shape and out.dtype == ref.dtype
    assert jnp.allclose(out, ref, rtol=1e-6, atol=0.0), "forward permutation mismatch"

    rev = jax.block_until_ready(layer.reverse(out))
    assert jnp.allclose(rev, x, rtol=1e-6, atol=0.0), "reverse permutation mismatch"

    # bfloat16 path (single native MXU pass, exact selection)
    x_bf = x.astype(jnp.bfloat16)
    out_bf = jax.block_until_ready(layer.forward(x_bf))
    ref_bf = x_bf[:, layer.indices]
    assert jnp.array_equal(out_bf, ref_bf), "bf16 forward permutation mismatch"

    print("KERNEL_OK")
</pallas_src>

<mosaic_0001>
module attributes {stable_mosaic.version = 11 : i64} {
  func.func @_permute_kernel_f32(%arg0: i32, %arg1: i32, %arg2: memref<16x128xf32, #tpu.memory_space<vmem>>, %arg3: memref<128x128xbf16, #tpu.memory_space<vmem>>, %arg4: memref<16x128xf32, #tpu.memory_space<vmem>>) attributes {dimension_semantics = [#tpu.dimension_semantics<parallel>, #tpu.dimension_semantics<parallel>], iteration_bounds = array<i64: 2, 1>, scalar_prefetch = 0 : i64, scratch_operands = 0 : i64, tpu.core_type = #tpu.core_type<tc>, window_params = [{transform_indices = @transform_0, window_bounds = array<i64: 16, 128>}, {pipeline_mode = #tpu.pipeline_mode<synchronous>, transform_indices = @transform_1, window_bounds = array<i64: 128, 128>}, {transform_indices = @transform_2, window_bounds = array<i64: 16, 128>}]} {
    %c0 = arith.constant 0 : index
    %c0_0 = arith.constant 0 : index
    %0 = vector.load %arg2[%c0, %c0_0] : memref<16x128xf32, #tpu.memory_space<vmem>>, vector<16x128xf32>
    %1 = arith.truncf %0 : vector<16x128xf32> to vector<16x128xbf16>
    %2 = arith.extf %1 : vector<16x128xbf16> to vector<16x128xf32>
    %3 = arith.subf %0, %2 : vector<16x128xf32>
    %4 = arith.truncf %3 : vector<16x128xf32> to vector<16x128xbf16>
    %5 = arith.extf %4 : vector<16x128xbf16> to vector<16x128xf32>
    %6 = arith.subf %3, %5 : vector<16x128xf32>
    %7 = arith.truncf %6 : vector<16x128xf32> to vector<16x128xbf16>
    %c0_1 = arith.constant 0 : index
    %c0_2 = arith.constant 0 : index
    %8 = vector.load %arg3[%c0_1, %c0_2] : memref<128x128xbf16, #tpu.memory_space<vmem>>, vector<128x128xbf16>
    %cst = arith.constant dense<0.000000e+00> : vector<16x128xf32>
    %9 = tpu.matmul %1, %8, %cst {dimension_numbers = #tpu.dot_dimension_numbers<[1], [0], [0], [1], [0, 0, 1, 1], [], []>} : vector<16x128xbf16>, vector<128x128xbf16>, vector<16x128xf32> -> vector<16x128xf32>
    %cst_3 = arith.constant dense<0.000000e+00> : vector<16x128xf32>
    %10 = tpu.matmul %4, %8, %cst_3 {dimension_numbers = #tpu.dot_dimension_numbers<[1], [0], [0], [1], [0, 0, 1, 1], [], []>} : vector<16x128xbf16>, vector<128x128xbf16>, vector<16x128xf32> -> vector<16x128xf32>
    %11 = arith.addf %9, %10 : vector<16x128xf32>
    %cst_4 = arith.constant dense<0.000000e+00> : vector<16x128xf32>
    %12 = tpu.matmul %7, %8, %cst_4 {dimension_numbers = #tpu.dot_dimension_numbers<[1], [0], [0], [1], [0, 0, 1, 1], [], []>} : vector<16x128xbf16>, vector<128x128xbf16>, vector<16x128xf32> -> vector<16x128xf32>
    %13 = arith.addf %11, %12 : vector<16x128xf32>
    %c0_5 = arith.constant 0 : index
    %c0_6 = arith.constant 0 : index
    %14 = vector.load %arg4[%c0_5, %c0_6] : memref<16x128xf32, #tpu.memory_space<vmem>>, vector<16x128xf32>
    tpu.vector_store %arg4[%c0_5, %c0_6], %13 {strides = array<i32>} : memref<16x128xf32, #tpu.memory_space<vmem>>, vector<16x128xf32>,
    return
  }
  func.func @transform_0(%arg0: i32, %arg1: i32) -> (i32, i32) {
    %c0_i32 = arith.constant 0 : i32
    %c0_i32_0 = arith.constant 0 : i32
    return %arg0, %c0_i32 : i32, i32
  }
  func.func @transform_1(%arg0: i32, %arg1: i32) -> (i32, i32) {
    %c0_i32 = arith.constant 0 : i32
    %c0_i32_0 = arith.constant 0 : i32
    return %c0_i32, %arg1 : i32, i32
  }
  func.func @transform_2(%arg0: i32, %arg1: i32) -> (i32, i32) {
    %c0_i32 = arith.constant 0 : i32
    return %arg0, %arg1 : i32, i32
  }
}

module attributes {stable_mosaic.version = 11 : i64} {
  func.func @_permute_kernel_f32(%arg0: i32, %arg1: i32, %arg2: memref<16x128xf32, #tpu.memory_space<vmem>>, %arg3: memref<128x128xbf16, #tpu.memory_space<vmem>>, %arg4: memref<16x128xf32, #tpu.memory_space<vmem>>) attributes {dimension_semantics = [#tpu.dimension_semantics<parallel>, #tpu.dimension_semantics<parallel>], iteration_bounds = array<i64: 2, 1>, scalar_prefetch = 0 : i64, scratch_operands = 0 : i64, tpu.core_type = #tpu.core_type<tc>, window_params = [{transform_indices = @transform_0, window_bounds = array<i64: 16, 128>}, {transform_indices = @transform_1, window_bounds = array<i64: 128, 128>}, {transform_indices = @transform_2, window_bounds = array<i64: 16, 128>}]} {
    %c0 = arith.constant 0 : index
    %c0_0 = arith.constant 0 : index
    %0 = vector.load %arg2[%c0, %c0_0] : memref<16x128xf32, #tpu.memory_space<vmem>>, vector<16x128xf32>
    %1 = arith.truncf %0 : vector<16x128xf32> to vector<16x128xbf16>
    %2 = arith.extf %1 : vector<16x128xbf16> to vector<16x128xf32>
    %3 = arith.subf %0, %2 : vector<16x128xf32>
    %4 = arith.truncf %3 : vector<16x128xf32> to vector<16x128xbf16>
    %5 = arith.extf %4 : vector<16x128xbf16> to vector<16x128xf32>
    %6 = arith.subf %3, %5 : vector<16x128xf32>
    %7 = arith.truncf %6 : vector<16x128xf32> to vector<16x128xbf16>
    %c0_1 = arith.constant 0 : index
    %c0_2 = arith.constant 0 : index
    %8 = vector.load %arg3[%c0_1, %c0_2] : memref<128x128xbf16, #tpu.memory_space<vmem>>, vector<128x128xbf16>
    %cst = arith.constant dense<0.000000e+00> : vector<16x128xf32>
    %9 = tpu.matmul %1, %8, %cst {dimension_numbers = #tpu.dot_dimension_numbers<[1], [0], [0], [1], [0, 0, 1, 1], [], []>} : vector<16x128xbf16>, vector<128x128xbf16>, vector<16x128xf32> -> vector<16x128xf32>
    %cst_3 = arith.constant dense<0.000000e+00> : vector<16x128xf32>
    %10 = tpu.matmul %4, %8, %cst_3 {dimension_numbers = #tpu.dot_dimension_numbers<[1], [0], [0], [1], [0, 0, 1, 1], [], []>} : vector<16x128xbf16>, vector<128x128xbf16>, vector<16x128xf32> -> vector<16x128xf32>
    %11 = arith.addf %9, %10 : vector<16x128xf32>
    %cst_4 = arith.constant dense<0.000000e+00> : vector<16x128xf32>
    %12 = tpu.matmul %7, %8, %cst_4 {dimension_numbers = #tpu.dot_dimension_numbers<[1], [0], [0], [1], [0, 0, 1, 1], [], []>} : vector<16x128xbf16>, vector<128x128xbf16>, vector<16x128xf32> -> vector<16x128xf32>
    %13 = arith.addf %11, %12 : vector<16x128xf32>
    %c0_5 = arith.constant 0 : index
    %c0_6 = arith.constant 0 : index
    %14 = vector.load %arg4[%c0_5, %c0_6] : memref<16x128xf32, #tpu.memory_space<vmem>>, vector<16x128xf32>
    tpu.vector_store %arg4[%c0_5, %c0_6], %13 {strides = array<i32>} : memref<16x128xf32, #tpu.memory_space<vmem>>, vector<16x128xf32>,
    return
  }
  func.func @transform_0(%arg0: i32, %arg1: i32) -> (i32, i32) {
    %c0_i32 = arith.constant 0 : i32
    %c0_i32_0 = arith.constant 0 : i32
    return %arg0, %c0_i32 : i32, i32
  }
  func.func @transform_1(%arg0: i32, %arg1: i32) -> (i32, i32) {
    %c0_i32 = arith.constant 0 : i32
    %c0_i32_0 = arith.constant 0 : i32
    return %c0_i32, %arg1 : i32, i32
  }
  func.func @transform_2(%arg0: i32, %arg1: i32) -> (i32, i32) {
    %c0_i32 = arith.constant 0 : i32
    return %arg0, %arg1 : i32, i32
  }
}

</mosaic_0001>

<bundles_post_ra>
// kernel: _permute_pallas.1
= control target key start
LH: loop header
LB: loop body
LE: loop exit
PB: predicated region body
PF: predicated region fallthrough
CT: control target
= control target key end

     0   :  { %7 = vsyncpa [#allocation3], 0  ;;  %s720_s9 = smov 0   ;;  %s722_s10 = smov 0   ;;  %s832_s0 = inlined_call_operand.vmem [shape: f32[32,128], index: 0, kind: input, shape index: {}]   ;;  %s833_s1 = inlined_call_operand.hbm [shape: bf16[128,128], index: 1, kind: input, shape index: {}]   ;;  %s834_s2 = inlined_call_operand.vmem [shape: f32[32,128], index: 2, kind: output, shape index: {}]  }
   0x1   :  { %s724_s11 = smov 0  }
   0x2 LB: > { %s483_s12 = sadd.s32 4294967295, %s698_s11   ;;  %s25_s13 = sadd.s32 1, %s694_s10  ;;  %s698_s11 = sphi %s724_s11, %s13_s11   ;;  %s694_s10 = sphi %s722_s10, %s844_s10   ;;  %s690_s9 = sphi %s720_s9, %s843_s9  }
   0x3   : > { %p27_p0 = scmp.ge.s32.totalorder %s25_s13, 2  ;;  %p485_p1 = scmp.ge.s32.totalorder %s698_s11, 1 }
   0x4   : > { %p110_p2 = scmp.lt.s32.totalorder %s698_s11, 3  ;;  %p745_p4 = scmp.eq.s32.totalorder %s483_s12, 0 }
   0x5   : > { %s846_s13 = smov (%p27_p0, %s25_s13), 0  ;;  %s700_s16 = smov [#allocation2]  }
   0x6   : > { %p741_p3 = pnand %p485_p1, %p110_p2  ;;  %s124_s17 = sshll.u32 %s700_s16, 4  ;;  %s125_s17 = int_to_ptr.vmem [resolvable:$true] %s124_s17 }
   0x7   : > { %s839_s15 = scalar_select %p745_p4, 1, 0 }
   0x8   : > { %s838_s14 = scalar_select %p741_p3, 1, 0 }
   0x9   : > { %p601_p5 = pneg %p741_p3  ;;  %s644_s21 = scalar_lea.hbm %s833_s1, 1024 }
   0xa   : > { %p645_p7 = scmp.ne.s32.totalorder %s833_s1, %s644_s21  ;;  %p651_p11 = scmp.lt.u32.totalorder %s644_s21, %s833_s1 }
   0xb   : > { %p753_p6 = pnand %p745_p4, %p601_p5 }
   0xd   : > { %p646_p8 = pneg %p753_p6 }
   0xf   : > { %p647_p9 = pnand %p646_p8, %p645_p7 }
  0x11   : > { %p648_p10 = pneg %p647_p9 }
  0x13   : > { %p653_p12 = pnand %p651_p11, %p648_p10 }
  0x15   : > { %656 = shalt.err (!%p653_p12)
}
  0x16   : > { %s657_s26 = scalar_lea.vmem %s125_s17, 1024  ;;  %p665_p2 = scmp.lt.s32.totalorder %s125_s17, %s125_s17 }
  0x17   : > { %p658_p13 = scmp.ne.s32.totalorder %s125_s17, %s657_s26  ;;  %p666_p5 = scmp.lt.s32.totalorder %s657_s26, %s657_s26 }
  0x19   : > { %p660_p0 = pnand %p658_p13, %p646_p8  ;;  %p667_p4 = por %p666_p5, %p665_p2 }
  0x1b   : > { %p661_p1 = pneg %p660_p0 }
  0x1d   : > { %p668_p3 = pnand %p667_p4, %p661_p1 }
  0x1f   : > { %671 = shalt.err (!%p668_p3)
}
  0x20   : > { %s701_s27 = smov 64   ;;  %s702_s28 = smov 4  }
  0x21   : > { %604 = dma.hbm_to_vmem [thread:$0]  (!%p753_p6), %s833_s1, 1024, %s125_s17, [#allocation3], %s701_s27, %s701_s27, %s702_s28  }
  0x22   : > { %p841_p7 = scmp.ne.s32.totalorder %s838_s14, 0 }
  0x23   : > { %p842_p9 = scmp.ne.s32.totalorder (!%p841_p7), %s839_s15, 0 }
  0x24   : > { %149 = sbr.rel (%p841_p7) target bundleno = 327 (0x147), region = 28 }
  0x2b   : > { %685 = dma.done.wait (%p842_p9), [#allocation3], 1024  }
  0x2c   : > { %687 = vsyncadd (%p842_p9), [#allocation3], 4294966272  ;;  %v703_v0 = vmov 0.0   ;;  %vm704_vm0 = vmmov 0   ;;  %v636_v1 = vld [vmem:[#allocation2] sm:$0xff]   ;;  %s490_s3 = sshll.u32 %s690_s9, 1 }
  0x2d   : > { %551 = vmatprep.subr.bf16.mxu0 %v703_v0  ;;  %531 = vmatprep.subr.bf16.mxu1 %v703_v0  ;;  %v637_v2 = vld [vmem:[#allocation2 + $0x8] sm:$0xff]   ;;  %p175_p3 = scmp.lt.s32.totalorder %s490_s3, 3  ;;  %v638_v3 = vld [vmem:[#allocation2 + $0x10] sm:$0xff]   ;;  %v639_v4 = vld [vmem:[#allocation2 + $0x18] sm:$0xff]  }
  0x2e   : > { %567 = vmatprep.mubr.msk.bf16.mxu0 %vm704_vm0, %v703_v0  ;;  %547 = vmatprep.mubr.msk.bf16.mxu1 %vm704_vm0, %v703_v0  ;;  %v640_v5 = vld [vmem:[#allocation2 + $0x20] sm:$0xff]   ;;  %v641_v6 = vld [vmem:[#allocation2 + $0x28] sm:$0xff]   ;;  %v642_v10 = vld [vmem:[#allocation2 + $0x30] sm:$0xff]  }
  0x2f   : > { %552 = vmatpush3.bf16.msra.mxu0 %v636_v1  ;;  %532 = vmatpush3.bf16.msra.mxu1 %v636_v1  ;;  %s848_s3 = smov (!%p175_p3, %s490_s3), 3  ;;  %v643_v13 = vld [vmem:[#allocation2 + $0x38] sm:$0xff]  }
  0x30   : > { %553 = vmatprep.subr.bf16.mxu0 %v703_v0  ;;  %533 = vmatprep.subr.bf16.mxu1 %v703_v0  ;;  %s491_s4 = sshll.u32 %s848_s3, 3 }
  0x31   : > { %s178_s7 = scalar_lea.vmem %s832_s0, %s491_s4  ;;  %s187_s12 = scalar_lea.vmem %s834_s2, %s491_s4 }
  0x32   : > { %v190_v7 = vld [vmem:[%s178_s7] sm:$0xff]  ;;  %v191_v8 = vld [vmem:[%s178_s7 + $0x8] sm:$0xff] }
  0x33   : > { %554 = vmatpush3.bf16.msra.mxu0 %v637_v2  ;;  %534 = vmatpush3.bf16.msra.mxu1 %v637_v2  ;;  %v192_v9 = vpack.c.bf16 %v191_v8, %v190_v7 }
  0x34   : > { %555 = vmatprep.subr.bf16.mxu0 %v703_v0  ;;  %535 = vmatprep.subr.bf16.mxu1 %v703_v0 }
  0x35   : > { %v193_v11 = vunpack.c.l.bf16 %v192_v9  ;;  %v194_v12 = vunpack.c.h.bf16 %v192_v9 }
  0x37   : > { %556 = vmatpush3.bf16.msra.mxu0 %v638_v3  ;;  %536 = vmatpush3.bf16.msra.mxu1 %v638_v3  ;;  %v195_v14 = vsub.f32 %v190_v7, %v193_v11  ;;  %v196_v15 = vsub.f32 %v191_v8, %v194_v12 }
  0x38   : > { %557 = vmatprep.subr.bf16.mxu0 %v703_v0  ;;  %537 = vmatprep.subr.bf16.mxu1 %v703_v0 }
  0x39   : > { %v197_v16 = vpack.c.bf16 %v196_v15, %v195_v14 }
  0x3b   : > { %558 = vmatpush3.bf16.msra.mxu0 %v639_v4  ;;  %538 = vmatpush3.bf16.msra.mxu1 %v639_v4  ;;  %v198_v17 = vunpack.c.l.bf16 %v197_v16  ;;  %v199_v18 = vunpack.c.h.bf16 %v197_v16 }
  0x3c   : > { %559 = vmatprep.subr.bf16.mxu0 %v703_v0  ;;  %539 = vmatprep.subr.bf16.mxu1 %v703_v0 }
  0x3d   : > { %v200_v19 = vsub.f32 %v195_v14, %v198_v17  ;;  %v201_v20 = vsub.f32 %v196_v15, %v199_v18 }
  0x3f   : > { %560 = vmatpush3.bf16.msra.mxu0 %v640_v5  ;;  %540 = vmatpush3.bf16.msra.mxu1 %v640_v5  ;;  %v202_v21 = vpack.c.bf16 %v201_v20, %v200_v19 }
  0x40   : > { %561 = vmatprep.subr.bf16.mxu0 %v703_v0  ;;  %541 = vmatprep.subr.bf16.mxu1 %v703_v0 }
  0x43   : > { %562 = vmatpush3.bf16.msra.mxu0 %v641_v6  ;;  %542 = vmatpush3.bf16.msra.mxu1 %v641_v6 }
  0x44   : > { %563 = vmatprep.subr.bf16.mxu0 %v703_v0  ;;  %543 = vmatprep.subr.bf16.mxu1 %v703_v0 }
  0x47   : > { %564 = vmatpush3.bf16.msra.mxu0 %v642_v10  ;;  %544 = vmatpush3.bf16.msra.mxu1 %v642_v10 }
  0x48   : > { %565 = vmatprep.subr.bf16.mxu0 %v703_v0  ;;  %545 = vmatprep.subr.bf16.mxu1 %v703_v0 }
  0x4b   : > { %566 = vmatpush3.bf16.msra.mxu0 %v643_v13  ;;  %546 = vmatpush3.bf16.msra.mxu1 %v643_v13 }
  0x4c   : > { %571 = vmatprep.subr.bf16.mxu0 %v703_v0 }
  0x4e   : > { %568 = vmatmul.mubr.bf16.vlgmr.msra.gmra.mrb[0].mxu0 %v192_v9  ;;  %548 = vmatmul.mubr.bf16.vlgmr.msra.gmra.mrb[0].mxu1 %v197_v16 }
  0x4f   : > { %572 = vmatpush3.bf16.msra.mxu0 %v636_v1  ;;  %587 = vmatprep.mubr.msk.bf16.mxu0 %vm704_vm0, %v703_v0 }
  0x50   : > { %573 = vmatprep.subr.bf16.mxu0 %v703_v0 }
  0x53   : > { %574 = vmatpush3.bf16.msra.mxu0 %v637_v2 }
  0x54   : > { %575 = vmatprep.subr.bf16.mxu0 %v703_v0 }
  0x57   : > { %576 = vmatpush3.bf16.msra.mxu0 %v638_v3 }
  0x58   : > { %577 = vmatprep.subr.bf16.mxu0 %v703_v0 }
  0x5b   : > { %578 = vmatpush3.bf16.msra.mxu0 %v639_v4 }
  0x5c   : > { %579 = vmatprep.subr.bf16.mxu0 %v703_v0 }
  0x5f   : > { %580 = vmatpush3.bf16.msra.mxu0 %v640_v5 }
  0x60   : > { %581 = vmatprep.subr.bf16.mxu0 %v703_v0 }
  0x63   : > { %582 = vmatpush3.bf16.msra.mxu0 %v641_v6 }
  0x64   : > { %583 = vmatprep.subr.bf16.mxu0 %v703_v0 }
  0x67   : > { %584 = vmatpush3.bf16.msra.mxu0 %v642_v10 }
  0x68   : > { %585 = vmatprep.subr.bf16.mxu0 %v703_v0 }
  0x6b   : > { %586 = vmatpush3.bf16.msra.mxu0 %v643_v13 }
  0x6e   : > { %588 = vmatmul.mubr.bf16.vlgmr.msra.gmra.mrb[0].mxu0 %v202_v21 }
 0x121   : > { %v301_v22 = vpop.f32.mrb[0].mxu1 }
 0x122   : > { %v549_v23 = vpop.f32.mrb[1].mxu1 }
 0x123   : > { %v304_v24 = vpop.f32.mrb[2].mxu1 }
 0x124   : > { %v550_v25 = vpop.f32.mrb[3].mxu1 }
 0x141   : > { %v383_v26 = vpop.f32.mrb[0].mxu0 }
 0x142   : > { %v591_v27 = vadd.f32 %v383_v26, %v301_v22  ;;  %v589_v28 = vpop.f32.mrb[1].mxu0 }
 0x143   : > { %v386_v29 = vpop.f32.mrb[2].mxu0 }
 0x144   : > { %392 = vst [vmem:[%s187_s12] sm:$0xff] %v591_v27  ;;  %v592_v30 = vadd.f32 %v386_v29, %v304_v24  ;;  %v590_v31 = vpop.f32.mrb[3].mxu0 }
 0x146   : > { %393 = vst [vmem:[%s187_s12 + $0x8] sm:$0xff] %v592_v30 }
 0x147 PF: > { %s13_s11 = sadd.s32 1, %s698_s11   ;;  %s843_s9 = smov %s694_s10 }
 0x148   : > { %p10_p4 = scmp.ge.s32.totalorder %s13_s11, 4   ;;  %s844_s10 = smov %s846_s13 }
 0x14a   :  { %12 = sbr.rel (!%p10_p4) target bundleno = 2 (0x2), region = 64 }
 0x151   :  { %422 = vsyncpa [#allocation3], 1 }
 0x152   :  { %424 = vsyncpa [#allocation3 + $0x1], 1 }

// kernel: _permute_pallas.1
= control target key start
LH: loop header
LB: loop body
LE: loop exit
PB: predicated region body
PF: predicated region fallthrough
CT: control target
= control target key end

     0   :  { %7 = vsyncpa [#allocation3], 0  ;;  %s720_s9 = smov 0   ;;  %s722_s10 = smov 0   ;;  %s832_s0 = inlined_call_operand.vmem [shape: f32[32,128], index: 0, kind: input, shape index: {}]   ;;  %s833_s1 = inlined_call_operand.hbm [shape: bf16[128,128], index: 1, kind: input, shape index: {}]   ;;  %s834_s2 = inlined_call_operand.vmem [shape: f32[32,128], index: 2, kind: output, shape index: {}]  }
   0x1   :  { %s724_s11 = smov 0  }
   0x2 LB: > { %s483_s12 = sadd.s32 4294967295, %s698_s11   ;;  %s25_s13 = sadd.s32 1, %s694_s10  ;;  %s698_s11 = sphi %s724_s11, %s13_s11   ;;  %s694_s10 = sphi %s722_s10, %s844_s10   ;;  %s690_s9 = sphi %s720_s9, %s843_s9  }
   0x3   : > { %p27_p0 = scmp.ge.s32.totalorder %s25_s13, 2  ;;  %p485_p1 = scmp.ge.s32.totalorder %s698_s11, 1 }
   0x4   : > { %p110_p2 = scmp.lt.s32.totalorder %s698_s11, 3  ;;  %p745_p4 = scmp.eq.s32.totalorder %s483_s12, 0 }
   0x5   : > { %s846_s13 = smov (%p27_p0, %s25_s13), 0  ;;  %s700_s16 = smov [#allocation2]  }
   0x6   : > { %p741_p3 = pnand %p485_p1, %p110_p2  ;;  %s124_s17 = sshll.u32 %s700_s16, 4  ;;  %s125_s17 = int_to_ptr.vmem [resolvable:$true] %s124_s17 }
   0x7   : > { %s839_s15 = scalar_select %p745_p4, 1, 0 }
   0x8   : > { %s838_s14 = scalar_select %p741_p3, 1, 0 }
   0x9   : > { %p601_p5 = pneg %p741_p3  ;;  %s644_s21 = scalar_lea.hbm %s833_s1, 1024 }
   0xa   : > { %p645_p7 = scmp.ne.s32.totalorder %s833_s1, %s644_s21  ;;  %p651_p11 = scmp.lt.u32.totalorder %s644_s21, %s833_s1 }
   0xb   : > { %p753_p6 = pnand %p745_p4, %p601_p5 }
   0xd   : > { %p646_p8 = pneg %p753_p6 }
   0xf   : > { %p647_p9 = pnand %p646_p8, %p645_p7 }
  0x11   : > { %p648_p10 = pneg %p647_p9 }
  0x13   : > { %p653_p12 = pnand %p651_p11, %p648_p10 }
  0x15   : > { %656 = shalt.err (!%p653_p12)
}
  0x16   : > { %s657_s26 = scalar_lea.vmem %s125_s17, 1024  ;;  %p665_p2 = scmp.lt.s32.totalorder %s125_s17, %s125_s17 }
  0x17   : > { %p658_p13 = scmp.ne.s32.totalorder %s125_s17, %s657_s26  ;;  %p666_p5 = scmp.lt.s32.totalorder %s657_s26, %s657_s26 }
  0x19   : > { %p660_p0 = pnand %p658_p13, %p646_p8  ;;  %p667_p4 = por %p666_p5, %p665_p2 }
  0x1b   : > { %p661_p1 = pneg %p660_p0 }
  0x1d   : > { %p668_p3 = pnand %p667_p4, %p661_p1 }
  0x1f   : > { %671 = shalt.err (!%p668_p3)
}
  0x20   : > { %s701_s27 = smov 64   ;;  %s702_s28 = smov 4  }
  0x21   : > { %604 = dma.hbm_to_vmem [thread:$0]  (!%p753_p6), %s833_s1, 1024, %s125_s17, [#allocation3], %s701_s27, %s701_s27, %s702_s28  }
  0x22   : > { %p841_p7 = scmp.ne.s32.totalorder %s838_s14, 0 }
  0x23   : > { %p842_p9 = scmp.ne.s32.totalorder (!%p841_p7), %s839_s15, 0 }
  0x24   : > { %149 = sbr.rel (%p841_p7) target bundleno = 327 (0x147), region = 28 }
  0x2b   : > { %685 = dma.done.wait (%p842_p9), [#allocation3], 1024  }
  0x2c   : > { %687 = vsyncadd (%p842_p9), [#allocation3], 4294966272  ;;  %v703_v0 = vmov 0.0   ;;  %vm704_vm0 = vmmov 0   ;;  %v636_v1 = vld [vmem:[#allocation2] sm:$0xff]   ;;  %s490_s3 = sshll.u32 %s690_s9, 1 }
  0x2d   : > { %551 = vmatprep.subr.bf16.mxu0 %v703_v0  ;;  %531 = vmatprep.subr.bf16.mxu1 %v703_v0  ;;  %v637_v2 = vld [vmem:[#allocation2 + $0x8] sm:$0xff]   ;;  %p175_p3 = scmp.lt.s32.totalorder %s490_s3, 3  ;;  %v638_v3 = vld [vmem:[#allocation2 + $0x10] sm:$0xff]   ;;  %v639_v4 = vld [vmem:[#allocation2 + $0x18] sm:$0xff]  }
  0x2e   : > { %567 = vmatprep.mubr.msk.bf16.mxu0 %vm704_vm0, %v703_v0  ;;  %547 = vmatprep.mubr.msk.bf16.mxu1 %vm704_vm0, %v703_v0  ;;  %v640_v5 = vld [vmem:[#allocation2 + $0x20] sm:$0xff]   ;;  %v641_v6 = vld [vmem:[#allocation2 + $0x28] sm:$0xff]   ;;  %v642_v10 = vld [vmem:[#allocation2 + $0x30] sm:$0xff]  }
  0x2f   : > { %552 = vmatpush3.bf16.msra.mxu0 %v636_v1  ;;  %532 = vmatpush3.bf16.msra.mxu1 %v636_v1  ;;  %s848_s3 = smov (!%p175_p3, %s490_s3), 3  ;;  %v643_v13 = vld [vmem:[#allocation2 + $0x38] sm:$0xff]  }
  0x30   : > { %553 = vmatprep.subr.bf16.mxu0 %v703_v0  ;;  %533 = vmatprep.subr.bf16.mxu1 %v703_v0  ;;  %s491_s4 = sshll.u32 %s848_s3, 3 }
  0x31   : > { %s178_s7 = scalar_lea.vmem %s832_s0, %s491_s4  ;;  %s187_s12 = scalar_lea.vmem %s834_s2, %s491_s4 }
  0x32   : > { %v190_v7 = vld [vmem:[%s178_s7] sm:$0xff]  ;;  %v191_v8 = vld [vmem:[%s178_s7 + $0x8] sm:$0xff] }
  0x33   : > { %554 = vmatpush3.bf16.msra.mxu0 %v637_v2  ;;  %534 = vmatpush3.bf16.msra.mxu1 %v637_v2  ;;  %v192_v9 = vpack.c.bf16 %v191_v8, %v190_v7 }
  0x34   : > { %555 = vmatprep.subr.bf16.mxu0 %v703_v0  ;;  %535 = vmatprep.subr.bf16.mxu1 %v703_v0 }
  0x35   : > { %v193_v11 = vunpack.c.l.bf16 %v192_v9  ;;  %v194_v12 = vunpack.c.h.bf16 %v192_v9 }
  0x37   : > { %556 = vmatpush3.bf16.msra.mxu0 %v638_v3  ;;  %536 = vmatpush3.bf16.msra.mxu1 %v638_v3  ;;  %v195_v14 = vsub.f32 %v190_v7, %v193_v11  ;;  %v196_v15 = vsub.f32 %v191_v8, %v194_v12 }
  0x38   : > { %557 = vmatprep.subr.bf16.mxu0 %v703_v0  ;;  %537 = vmatprep.subr.bf16.mxu1 %v703_v0 }
  0x39   : > { %v197_v16 = vpack.c.bf16 %v196_v15, %v195_v14 }
  0x3b   : > { %558 = vmatpush3.bf16.msra.mxu0 %v639_v4  ;;  %538 = vmatpush3.bf16.msra.mxu1 %v639_v4  ;;  %v198_v17 = vunpack.c.l.bf16 %v197_v16  ;;  %v199_v18 = vunpack.c.h.bf16 %v197_v16 }
  0x3c   : > { %559 = vmatprep.subr.bf16.mxu0 %v703_v0  ;;  %539 = vmatprep.subr.bf16.mxu1 %v703_v0 }
  0x3d   : > { %v200_v19 = vsub.f32 %v195_v14, %v198_v17  ;;  %v201_v20 = vsub.f32 %v196_v15, %v199_v18 }
  0x3f   : > { %560 = vmatpush3.bf16.msra.mxu0 %v640_v5  ;;  %540 = vmatpush3.bf16.msra.mxu1 %v640_v5  ;;  %v202_v21 = vpack.c.bf16 %v201_v20, %v200_v19 }
  0x40   : > { %561 = vmatprep.subr.bf16.mxu0 %v703_v0  ;;  %541 = vmatprep.subr.bf16.mxu1 %v703_v0 }
  0x43   : > { %562 = vmatpush3.bf16.msra.mxu0 %v641_v6  ;;  %542 = vmatpush3.bf16.msra.mxu1 %v641_v6 }
  0x44   : > { %563 = vmatprep.subr.bf16.mxu0 %v703_v0  ;;  %543 = vmatprep.subr.bf16.mxu1 %v703_v0 }
  0x47   : > { %564 = vmatpush3.bf16.msra.mxu0 %v642_v10  ;;  %544 = vmatpush3.bf16.msra.mxu1 %v642_v10 }
  0x48   : > { %565 = vmatprep.subr.bf16.mxu0 %v703_v0  ;;  %545 = vmatprep.subr.bf16.mxu1 %v703_v0 }
  0x4b   : > { %566 = vmatpush3.bf16.msra.mxu0 %v643_v13  ;;  %546 = vmatpush3.bf16.msra.mxu1 %v643_v13 }
  0x4c   : > { %571 = vmatprep.subr.bf16.mxu0 %v703_v0 }
  0x4e   : > { %568 = vmatmul.mubr.bf16.vlgmr.msra.gmra.mrb[0].mxu0 %v192_v9  ;;  %548 = vmatmul.mubr.bf16.vlgmr.msra.gmra.mrb[0].mxu1 %v197_v16 }
  0x4f   : > { %572 = vmatpush3.bf16.msra.mxu0 %v636_v1  ;;  %587 = vmatprep.mubr.msk.bf16.mxu0 %vm704_vm0, %v703_v0 }
  0x50   : > { %573 = vmatprep.subr.bf16.mxu0 %v703_v0 }
  0x53   : > { %574 = vmatpush3.bf16.msra.mxu0 %v637_v2 }
  0x54   : > { %575 = vmatprep.subr.bf16.mxu0 %v703_v0 }
  0x57   : > { %576 = vmatpush3.bf16.msra.mxu0 %v638_v3 }
  0x58   : > { %577 = vmatprep.subr.bf16.mxu0 %v703_v0 }
  0x5b   : > { %578 = vmatpush3.bf16.msra.mxu0 %v639_v4 }
  0x5c   : > { %579 = vmatprep.subr.bf16.mxu0 %v703_v0 }
  0x5f   : > { %580 = vmatpush3.bf16.msra.mxu0 %v640_v5 }
  0x60   : > { %581 = vmatprep.subr.bf16.mxu0 %v703_v0 }
  0x63   : > { %582 = vmatpush3.bf16.msra.mxu0 %v641_v6 }
  0x64   : > { %583 = vmatprep.subr.bf16.mxu0 %v703_v0 }
  0x67   : > { %584 = vmatpush3.bf16.msra.mxu0 %v642_v10 }
  0x68   : > { %585 = vmatprep.subr.bf16.mxu0 %v703_v0 }
  0x6b   : > { %586 = vmatpush3.bf16.msra.mxu0 %v643_v13 }
  0x6e   : > { %588 = vmatmul.mubr.bf16.vlgmr.msra.gmra.mrb[0].mxu0 %v202_v21 }
 0x121   : > { %v301_v22 = vpop.f32.mrb[0].mxu1 }
 0x122   : > { %v549_v23 = vpop.f32.mrb[1].mxu1 }
 0x123   : > { %v304_v24 = vpop.f32.mrb[2].mxu1 }
 0x124   : > { %v550_v25 = vpop.f32.mrb[3].mxu1 }
 0x141   : > { %v383_v26 = vpop.f32.mrb[0].mxu0 }
 0x142   : > { %v591_v27 = vadd.f32 %v383_v26, %v301_v22  ;;  %v589_v28 = vpop.f32.mrb[1].mxu0 }
 0x143   : > { %v386_v29 = vpop.f32.mrb[2].mxu0 }
 0x144   : > { %392 = vst [vmem:[%s187_s12] sm:$0xff] %v591_v27  ;;  %v592_v30 = vadd.f32 %v386_v29, %v304_v24  ;;  %v590_v31 = vpop.f32.mrb[3].mxu0 }
 0x146   : > { %393 = vst [vmem:[%s187_s12 + $0x8] sm:$0xff] %v592_v30 }
 0x147 PF: > { %s13_s11 = sadd.s32 1, %s698_s11   ;;  %s843_s9 = smov %s694_s10 }
 0x148   : > { %p10_p4 = scmp.ge.s32.totalorder %s13_s11, 4   ;;  %s844_s10 = smov %s846_s13 }
 0x14a   :  { %12 = sbr.rel (!%p10_p4) target bundleno = 2 (0x2), region = 64 }
 0x151   :  { %422 = vsyncpa [#allocation3], 1 }
 0x152   :  { %424 = vsyncpa [#allocation3 + $0x1], 1 }

</bundles_post_ra>
